<compile_context>
chip_gen: v5e
topology: v5e:2x2
jax: 0.10.0
libtpu: 0.0.40
codegen_flags: <defaults>
</compile_context>

<pallas_src>
import functools

import jax
import jax.numpy as jnp
from jax.experimental import pallas as pl
from jax.experimental.pallas import tpu as pltpu

BN_EPS = 1e-5


def _gate_kernel(x_ref, w1_ref, b1_ref, w2_ref, b2_ref, gate_ref, acc_ref,
                 *, hw, thw, needs_mask):
    # x_ref:    (TB, C, thw)  input tile for (batch tile b, spatial tile s)
    # w1_ref:   (C, Ch)   b1_ref: (1, Ch)   (eval-mode BN and 1/HW folded in)
    # w2_ref:   (Ch, C)   b2_ref: (1, C)
    # gate_ref: (TB, 1, C)    per-batch gate logits (written at last s step)
    # acc_ref:  (TB, C) f32   spatial-sum accumulator, persists across s
    s = pl.program_id(1)

    @pl.when(s == 0)
    def _():
        acc_ref[...] = jnp.zeros_like(acc_ref)

    x = x_ref[...].astype(jnp.float32)                     # (TB, C, thw)
    if needs_mask:
        # Ragged tail: padded lanes of the last partial block are not
        # guaranteed zero -> mask before accumulating.
        lane = jax.lax.broadcasted_iota(jnp.int32, x.shape, 2)
        x = jnp.where(lane < (hw - s * thw), x, 0.0)
    acc_ref[...] += jnp.sum(x, axis=-1)                    # (TB, C)

    @pl.when(s == pl.num_programs(1) - 1)
    def _():
        # 1/HW and BatchNorm are folded into (w1, b1): feed the raw sum.
        h = jnp.dot(acc_ref[...], w1_ref[...],
                    preferred_element_type=jnp.float32) + b1_ref[...]
        h = jnp.maximum(h, 0.0)                            # ReLU
        g = jnp.dot(h, w2_ref[...],
                    preferred_element_type=jnp.float32) + b2_ref[...]
        gate_ref[...] = g[:, None, :].astype(gate_ref.dtype)


def _vmem_capacity_bytes():
    """Physical VMEM per TensorCore (generation-aware), with a safe fallback."""
    try:
        info = pltpu.get_tpu_info()
        cap = getattr(info, "vmem_capacity_bytes", None)
        if cap:
            return int(cap)
    except Exception:
        pass
    return 64 * 1024 * 1024      # conservative: v7x per-TC VMEM


def _choose_batch_tile(b):
    """Largest divisor of B that is <= 8 (f32 sublanes), but keep the
    'parallel' batch grid extent >= 2 when possible (v7x megacore)."""
    tb = 1
    for cand in (8, 4, 2):
        if b % cand == 0:
            tb = cand
            break
    while tb > 1 and b // tb < 2:
        tb //= 2
    return tb


def _choose_spatial_tile(tb, c, hw, slab_budget_bytes, itemsize):
    """Per-buffer x tile (tb, c, thw).  Returns (thw, needs_mask)."""
    max_elems = max(slab_budget_bytes // itemsize, 1)
    if tb * c * hw <= max_elems or hw <= 128:
        return hw, False                                   # whole row per step
    t_max = (max_elems // (tb * c)) // 128 * 128
    t_max = max(min(t_max, (hw // 128) * 128), 128)
    t = t_max
    while t >= 128:                                        # prefer a dividing tile
        if hw % t == 0:
            return t, False
        t -= 128
    return t_max, True                                     # ragged tail -> mask


def fold_batchnorm(w1, b1, gamma, beta, running_mean, running_var, eps=BN_EPS):
    """One-time host-side constant fold of eval-mode BatchNorm1d into FC1."""
    scale = gamma * jax.lax.rsqrt(running_var + eps)          # (1, Ch)
    return w1 * scale, (b1 - running_mean) * scale + beta


def channel_gate(x, w1f, b1f, w2, b2, *,
                 total_vmem_budget_bytes=None, spatial_tile=None):
    """x: (B, C, H, W) NCHW (f32 or bf16). w1f/b1f already have BN folded in.
    Returns (B, C, H, W): per-(B, C) gate logits expanded over H, W."""
    B, C, H, W = x.shape
    assert H == W, "avg_pool2d(kernel=H, stride=H) collapses to 1x1 only when H == W"
    HW = H * W
    Ch = w1f.shape[1]
    itemsize = jnp.dtype(x.dtype).itemsize

    TB = _choose_batch_tile(B)

    # Fold 1/HW (global average pool) into FC1's weight; bias is untouched.
    w1s = (w1f * (1.0 / HW)).astype(jnp.float32)
    b1s = b1f.astype(jnp.float32)
    w2s = w2.astype(jnp.float32)
    b2s = b2.astype(jnp.float32)

    # ---- VMEM accounting (every pipelined operand is double-buffered) ------
    const_bytes = 2 * (C * Ch + Ch + Ch * C + C) * 4       # weights/biases (f32)
    out_bytes = 2 * TB * C * 4                             # (TB, 1, C) gate block
    acc_bytes = TB * C * 4                                 # accumulator scratch
    headroom = 2 * 1024 * 1024

    vmem_cap = _vmem_capacity_bytes()
    total_budget = total_vmem_budget_bytes
    if total_budget is None:
        # ~3/4 of physical VMEM, capped: ~96 MiB on v5e/v6e (128 MiB VMEM),
        # ~48 MiB on v7x (64 MiB per TC).
        total_budget = min(vmem_cap * 3 // 4, 100 * 1024 * 1024)
    slab_budget = max(
        (total_budget - const_bytes - out_bytes - acc_bytes - headroom) // 2,
        128 * 1024)

    if spatial_tile is None:
        thw, needs_mask = _choose_spatial_tile(TB, C, HW, slab_budget, itemsize)
    else:
        thw = min(int(spatial_tile), HW)
        needs_mask = (HW % thw) != 0

    grid = (B // TB, pl.cdiv(HW, thw))
    x3 = x.reshape(B, C, HW)

    # Compiler limit derived from the actual footprint (consistent with tiling).
    x_slab_bytes = TB * C * thw * itemsize
    vmem_limit = int(min(
        max(2 * x_slab_bytes + const_bytes + out_bytes + acc_bytes + headroom,
            8 * 1024 * 1024),
        vmem_cap))

    def const_spec(shape):
        # Constant index_map: same block every step, stays VMEM-resident
        # (its 2x buffered footprint is charged in const_bytes above).
        return pl.BlockSpec(shape, lambda b, s: (0,) * len(shape))

    cost = pl.CostEstimate(
        flops=int(B * C * HW + 4 * B * C * Ch),
        transcendentals=0,
        bytes_accessed=int(B * C * HW * itemsize
                           + (B * C + 2 * C * Ch + Ch + C) * 4),
    )

    gate = pl.pallas_call(
        functools.partial(_gate_kernel, hw=HW, thw=thw, needs_mask=needs_mask),
        out_shape=jax.ShapeDtypeStruct((B, 1, C), jnp.float32),
        grid_spec=pltpu.PrefetchScalarGridSpec(
            num_scalar_prefetch=0,
            grid=grid,
            in_specs=[
                pl.BlockSpec((TB, C, thw), lambda b, s: (b, 0, s)),  # x (pipelined)
                const_spec((C, Ch)),                                 # w1 (BN + 1/HW folded)
                const_spec((1, Ch)),                                 # b1 (BN folded)
                const_spec((Ch, C)),                                 # w2
                const_spec((1, C)),                                  # b2
            ],
            out_specs=pl.BlockSpec((TB, 1, C), lambda b, s: (b, 0, 0)),
            scratch_shapes=[pltpu.VMEM((TB, C), jnp.float32)],
        ),
        compiler_params=pltpu.CompilerParams(
            dimension_semantics=("parallel", "arbitrary"),
            vmem_limit_bytes=vmem_limit,
        ),
        cost_estimate=cost,
    )(x3, w1s, b1s, w2s, b2s)

    # expand_as: lazy broadcast in the wrapper so XLA fuses it into the
    # downstream consumer instead of the kernel streaming B*C*H*W to HBM.
    gate = gate.reshape(B, C).astype(x.dtype)
    return jnp.broadcast_to(gate[:, :, None, None], (B, C, H, W))


def make_params(key, gate_channel, reduction_ratio=16):
    """Deterministic synthetic parameters matching nn.Linear / nn.BatchNorm1d."""
    c = gate_channel
    ch = gate_channel // reduction_ratio
    k1, k2, k3, k4, k5, k6, k7, k8 = jax.random.split(key, 8)
    # Linear weights stored pre-transposed: (in, out) so kernel does x @ W.
    w1 = jax.random.normal(k1, (c, ch), jnp.float32) * (1.0 / jnp.sqrt(c))
    b1 = jax.random.normal(k2, (1, ch), jnp.float32) * 0.02
    w2 = jax.random.normal(k3, (ch, c), jnp.float32) * (1.0 / jnp.sqrt(ch))
    b2 = jax.random.normal(k4, (1, c), jnp.float32) * 0.02
    # BatchNorm1d (eval-mode) parameters.
    gamma = 1.0 + 0.1 * jax.random.normal(k5, (1, ch), jnp.float32)
    beta = 0.1 * jax.random.normal(k6, (1, ch), jnp.float32)
    running_mean = 0.1 * jax.random.normal(k7, (1, ch), jnp.float32)
    running_var = jnp.abs(1.0 + 0.1 * jax.random.normal(k8, (1, ch), jnp.float32))
    return w1, b1, gamma, beta, running_mean, running_var, w2, b2


def channel_gate_reference(x, w1, b1, gamma, beta, running_mean, running_var,
                           w2, b2):
    """Pure-JAX reference (explicit eval-mode BN) for correctness check."""
    B, C, H, W = x.shape
    avg = jnp.mean(x.reshape(B, C, H * W).astype(jnp.float32), axis=-1)
    h = avg @ w1 + b1
    h = (h - running_mean) * jax.lax.rsqrt(running_var + BN_EPS) * gamma + beta
    h = jnp.maximum(h, 0.0)
    g = h @ w2 + b2
    g = g.astype(x.dtype)
    return jnp.broadcast_to(g[:, :, None, None], (B, C, H, W))


if __name__ == "__main__":
    # Small shapes consistent with the module: gate_channel=64, reduction=16 -> hidden=4.
    B, C, H, W = 2, 64, 16, 16
    key = jax.random.PRNGKey(0)
    kx, kp, kx3 = jax.random.split(key, 3)
    x = jax.random.normal(kx, (B, C, H, W), jnp.float32)
    params = make_params(kp, gate_channel=C, reduction_ratio=16)
    w1, b1, gamma, beta, running_mean, running_var, w2, b2 = params

    # One-time constant fold of eval-mode BatchNorm into FC1.
    w1f, b1f = fold_batchnorm(w1, b1, gamma, beta, running_mean, running_var)

    ref = channel_gate_reference(x, *params)

    # 1) Default generation-aware budget: whole HW row per grid step.
    out = jax.block_until_ready(channel_gate(x, w1f, b1f, w2, b2))
    assert out.shape == (B, C, H, W)
    assert jnp.allclose(out, ref, atol=1e-4, rtol=1e-4), "mismatch (default tiling)"

    # 2) Forced small spatial tile: exercises the multi-step accumulation path.
    out2 = jax.block_until_ready(
        channel_gate(x, w1f, b1f, w2, b2, spatial_tile=128))
    assert jnp.allclose(out2, ref, atol=1e-4, rtol=1e-4), "mismatch (tiled spatial)"

    # 3) Ragged spatial extent (H=W=14 -> HW=196, not a multiple of 128):
    #    exercises the masked partial-tail path and TB batch blocking (TB=2).
    B3, H3, W3 = 4, 14, 14
    x3 = jax.random.normal(kx3, (B3, C, H3, W3), jnp.float32)
    ref3 = channel_gate_reference(x3, *params)
    out3 = jax.block_until_ready(
        channel_gate(x3, w1f, b1f, w2, b2, spatial_tile=128))
    assert out3.shape == (B3, C, H3, W3)
    assert jnp.allclose(out3, ref3, atol=1e-4, rtol=1e-4), "mismatch (ragged tail)"

    print("KERNEL_OK")
</pallas_src>

<mosaic_0001>
module attributes {stable_mosaic.version = 11 : i64} {
  func.func @_gate_kernel(%arg0: i32, %arg1: i32, %arg2: memref<1x64x256xf32, #tpu.memory_space<vmem>>, %arg3: memref<64x4xf32, #tpu.memory_space<vmem>>, %arg4: memref<1x4xf32, #tpu.memory_space<vmem>>, %arg5: memref<4x64xf32, #tpu.memory_space<vmem>>, %arg6: memref<1x64xf32, #tpu.memory_space<vmem>>, %arg7: memref<1x1x64xf32, #tpu.memory_space<vmem>>, %arg8: memref<1x64xf32, #tpu.memory_space<vmem>>) attributes {dimension_semantics = [#tpu.dimension_semantics<parallel>, #tpu.dimension_semantics<arbitrary>], iteration_bounds = array<i64: 2, 1>, scalar_prefetch = 0 : i64, scratch_operands = 1 : i64, tpu.core_type = #tpu.core_type<tc>, window_params = [{transform_indices = @transform_0, window_bounds = array<i64: 1, 64, 256>}, {pipeline_mode = #tpu.pipeline_mode<synchronous>, transform_indices = @transform_1, window_bounds = array<i64: 64, 4>}, {pipeline_mode = #tpu.pipeline_mode<synchronous>, transform_indices = @transform_2, window_bounds = array<i64: 1, 4>}, {pipeline_mode = #tpu.pipeline_mode<synchronous>, transform_indices = @transform_3, window_bounds = array<i64: 4, 64>}, {pipeline_mode = #tpu.pipeline_mode<synchronous>, transform_indices = @transform_4, window_bounds = array<i64: 1, 64>}, {transform_indices = @transform_5, window_bounds = array<i64: 1, 1, 64>}]} {
    %c0_i32 = arith.constant 0 : i32
    %0 = arith.cmpi eq, %arg1, %c0_i32 : i32
    %1 = arith.extui %0 : i1 to i32
    %c0_i32_0 = arith.constant 0 : i32
    %2 = arith.cmpi ne, %1, %c0_i32_0 : i32
    scf.if %2 {
      %cst_9 = arith.constant 0.000000e+00 : f32
      %11 = vector.broadcast %cst_9 : f32 to vector<1x64xf32>
      %c0_10 = arith.constant 0 : index
      %c0_11 = arith.constant 0 : index
      %12 = vector.load %arg8[%c0_10, %c0_11] : memref<1x64xf32, #tpu.memory_space<vmem>>, vector<1x64xf32>
      tpu.vector_store %arg8[%c0_10, %c0_11], %11 {strides = array<i32>} : memref<1x64xf32, #tpu.memory_space<vmem>>, vector<1x64xf32>,
    } else {
    }
    %c0 = arith.constant 0 : index
    %c0_1 = arith.constant 0 : index
    %c0_2 = arith.constant 0 : index
    %3 = vector.load %arg2[%c0, %c0_1, %c0_2] : memref<1x64x256xf32, #tpu.memory_space<vmem>>, vector<1x64x256xf32>
    %c0_3 = arith.constant 0 : index
    %c0_4 = arith.constant 0 : index
    %4 = vector.load %arg8[%c0_3, %c0_4] : memref<1x64xf32, #tpu.memory_space<vmem>>, vector<1x64xf32>
    %cst = arith.constant dense<0.000000e+00> : vector<1x64xf32>
    %5 = vector.multi_reduction <add>, %3, %cst [2] : vector<1x64x256xf32> to vector<1x64xf32>
    %6 = arith.addf %4, %5 : vector<1x64xf32>
    %c0_5 = arith.constant 0 : index
    %c0_6 = arith.constant 0 : index
    %7 = vector.load %arg8[%c0_5, %c0_6] : memref<1x64xf32, #tpu.memory_space<vmem>>, vector<1x64xf32>
    tpu.vector_store %arg8[%c0_5, %c0_6], %6 {strides = array<i32>} : memref<1x64xf32, #tpu.memory_space<vmem>>, vector<1x64xf32>,
    %c0_i32_7 = arith.constant 0 : i32
    %8 = arith.cmpi eq, %arg1, %c0_i32_7 : i32
    %9 = arith.extui %8 : i1 to i32
    %c0_i32_8 = arith.constant 0 : i32
    %10 = arith.cmpi ne, %9, %c0_i32_8 : i32
    scf.if %10 {
      %c0_9 = arith.constant 0 : index
      %c0_10 = arith.constant 0 : index
      %11 = vector.load %arg8[%c0_9, %c0_10] : memref<1x64xf32, #tpu.memory_space<vmem>>, vector<1x64xf32>
      %c0_11 = arith.constant 0 : index
      %c0_12 = arith.constant 0 : index
      %12 = vector.load %arg3[%c0_11, %c0_12] : memref<64x4xf32, #tpu.memory_space<vmem>>, vector<64x4xf32>
      %cst_13 = arith.constant dense<0.000000e+00> : vector<1x4xf32>
      %13 = tpu.matmul %11, %12, %cst_13 {dimension_numbers = #tpu.dot_dimension_numbers<[1], [0], [0], [1], [0, 0, 1, 1], [], []>} : vector<1x64xf32>, vector<64x4xf32>, vector<1x4xf32> -> vector<1x4xf32>
      %c0_14 = arith.constant 0 : index
      %c0_15 = arith.constant 0 : index
      %14 = vector.load %arg4[%c0_14, %c0_15] : memref<1x4xf32, #tpu.memory_space<vmem>>, vector<1x4xf32>
      %15 = arith.addf %13, %14 : vector<1x4xf32>
      %cst_16 = arith.constant 0.000000e+00 : f32
      %16 = vector.broadcast %cst_16 : f32 to vector<1x4xf32>
      %17 = arith.maximumf %15, %16 : vector<1x4xf32>
      %c0_17 = arith.constant 0 : index
      %c0_18 = arith.constant 0 : index
      %18 = vector.load %arg5[%c0_17, %c0_18] : memref<4x64xf32, #tpu.memory_space<vmem>>, vector<4x64xf32>
      %cst_19 = arith.constant dense<0.000000e+00> : vector<1x64xf32>
      %19 = tpu.matmul %17, %18, %cst_19 {dimension_numbers = #tpu.dot_dimension_numbers<[1], [0], [0], [1], [0, 0, 1, 1], [], []>} : vector<1x4xf32>, vector<4x64xf32>, vector<1x64xf32> -> vector<1x64xf32>
      %c0_20 = arith.constant 0 : index
      %c0_21 = arith.constant 0 : index
      %20 = vector.load %arg6[%c0_20, %c0_21] : memref<1x64xf32, #tpu.memory_space<vmem>>, vector<1x64xf32>
      %21 = arith.addf %19, %20 : vector<1x64xf32>
      %22 = vector.shape_cast %21 : vector<1x64xf32> to vector<1x1x64xf32>
      %c0_22 = arith.constant 0 : index
      %c0_23 = arith.constant 0 : index
      %c0_24 = arith.constant 0 : index
      %23 = vector.load %arg7[%c0_22, %c0_23, %c0_24] : memref<1x1x64xf32, #tpu.memory_space<vmem>>, vector<1x1x64xf32>
      tpu.vector_store %arg7[%c0_22, %c0_23, %c0_24], %22 {strides = array<i32>} : memref<1x1x64xf32, #tpu.memory_space<vmem>>, vector<1x1x64xf32>,
    } else {
    }
    return
  }
  func.func @transform_0(%arg0: i32, %arg1: i32) -> (i32, i32, i32) {
    %c0_i32 = arith.constant 0 : i32
    %c0_i32_0 = arith.constant 0 : i32
    return %arg0, %c0_i32, %arg1 : i32, i32, i32
  }
  func.func @transform_1(%arg0: i32, %arg1: i32) -> (i32, i32) {
    %c0_i32 = arith.constant 0 : i32
    %c0_i32_0 = arith.constant 0 : i32
    %c0_i32_1 = arith.constant 0 : i32
    return %c0_i32, %c0_i32_0 : i32, i32
  }
  func.func @transform_2(%arg0: i32, %arg1: i32) -> (i32, i32) {
    %c0_i32 = arith.constant 0 : i32
    %c0_i32_0 = arith.constant 0 : i32
    %c0_i32_1 = arith.constant 0 : i32
    return %c0_i32, %c0_i32_0 : i32, i32
  }
  func.func @transform_3(%arg0: i32, %arg1: i32) -> (i32, i32) {
    %c0_i32 = arith.constant 0 : i32
    %c0_i32_0 = arith.constant 0 : i32
    %c0_i32_1 = arith.constant 0 : i32
    return %c0_i32, %c0_i32_0 : i32, i32
  }
  func.func @transform_4(%arg0: i32, %arg1: i32) -> (i32, i32) {
    %c0_i32 = arith.constant 0 : i32
    %c0_i32_0 = arith.constant 0 : i32
    %c0_i32_1 = arith.constant 0 : i32
    return %c0_i32, %c0_i32_0 : i32, i32
  }
  func.func @transform_5(%arg0: i32, %arg1: i32) -> (i32, i32, i32) {
    %c0_i32 = arith.constant 0 : i32
    %c0_i32_0 = arith.constant 0 : i32
    %c0_i32_1 = arith.constant 0 : i32
    return %arg0, %c0_i32, %c0_i32_0 : i32, i32, i32
  }
}

</mosaic_0001>

<bundles_post_ra>
// kernel: tpu_custom_call.1
= control target key start
LH: loop header
LB: loop body
LE: loop exit
PB: predicated region body
PF: predicated region fallthrough
CT: control target
= control target key end

     0   :  { %10 = vsyncpa [#allocation4], 0  ;;  %s1066_s0 = inlined_call_operand.hbm [shape: f32[2,64,256], index: 0, kind: input, shape index: {}]   ;;  %s1067_s1 = inlined_call_operand.vmem [shape: f32[64,4], index: 1, kind: input, shape index: {}]   ;;  %s1068_s2 = inlined_call_operand.vmem [shape: f32[1,4], index: 2, kind: input, shape index: {}]   ;;  %s1069_s3 = inlined_call_operand.vmem [shape: f32[4,64], index: 3, kind: input, shape index: {}]   ;;  %s1070_s4 = inlined_call_operand.vmem [shape: f32[1,64], index: 4, kind: input, shape index: {}]   ;;  %s1071_s5 = inlined_call_operand.hbm [shape: f32[2,1,64], index: 5, kind: output, shape index: {}]  }
   0x1   :  { %12 = vsyncpa [#allocation4 + $0x1], 0 }
   0x2   :  { %13 = vsyncpa [#allocation5], 0 }
   0x3   :  { %15 = vsyncpa [#allocation5 + $0x1], 0  ;;  %s909_s18 = smov 0   ;;  %s911_s19 = smov 0  }
   0x4   :  { %s913_s20 = smov 0   ;;  %s915_s21 = smov 0  }
   0x5   :  { %s917_s22 = smov 0   ;;  %s919_s23 = smov 0  }
   0x6 LB: > { %s677_s24 = sadd.s32 4294967295, %s873_s23   ;;  %s678_s25 = sadd.s32 4294967294, %s873_s23   ;;  %s873_s23 = sphi %s919_s23, %s21_s23   ;;  %s869_s22 = sphi %s917_s22, %s1080_s22   ;;  %s865_s21 = sphi %s915_s21, %s1079_s21   ;;  %s861_s20 = sphi %s913_s20, %s1078_s20   ;;  %s857_s19 = sphi %s911_s19, %s1077_s19   ;;  %s853_s18 = sphi %s909_s18, %s1076_s18  }
   0x7   : > { %s33_s26 = sadd.s32 1, %s869_s22  ;;  %s42_s27 = sadd.s32 1, %s861_s20 }
   0x8   : > { %p35_p0 = scmp.ge.s32.totalorder %s33_s26, 2  ;;  %p49_p1 = scmp.ne.s32.totalorder %s861_s20, %s857_s19 }
   0x9   : > { %p50_p2 = scmp.eq.s32.totalorder %s873_s23, 0  ;;  %p55_p3 = scmp.ne.s32.totalorder %s857_s19, %s853_s18 }
   0xa   : > { %s1082_s26 = smov (%p35_p0, %s33_s26), 0  ;;  %p56_p5 = scmp.eq.s32.totalorder %s677_s24, 0 }
   0xb   : > { %p950_p4 = por %p50_p2, %p49_p1  ;;  %s37_s29 = ssub.s32 %s869_s22, %s1082_s26 }
   0xc   : > { %p163_p6 = scmp.eq.s32.totalorder %s677_s24, 1  ;;  %p40_p7 = scmp.eq.s32.totalorder %s37_s29, 0 }
   0xd   : > { %p956_p8 = por %p56_p5, %p55_p3  ;;  %p169_p10 = scmp.eq.s32.totalorder %s678_s25, 1 }
   0xe   : > { %p960_p9 = por %p163_p6, %p49_p1  ;;  %p680_p12 = scmp.ge.s32.totalorder %s873_s23, 2 }
   0xf   : > { %s965_s7 = scalar_select %p40_p7, %s861_s20, %s42_s27  }
  0x10   : > { %p967_p11 = por %p169_p10, %p55_p3  ;;  %p704_p13 = scmp.lt.s32.totalorder %s873_s23, 2 }
  0x11   : > { %s201_s9 = sand.u32 1, %s861_s20   ;;  %s691_s11 = sshll.u32 %s869_s22, 7 }
  0x12   : > { %s681_s10 = sshll.u32 %s201_s9, 7  ;;  %s212_s14 = scalar_lea.hbm %s1066_s0, %s691_s11 }
  0x13   : > { %s205_s15 = scalar_lea.vmem [#allocation3], %s681_s10  ;;  %s213_s17 = sshll.u32 %s212_s14, 4  ;;  %s214_s17 = int_to_ptr.hbm [resolvable:$true] %s213_s17 }
  0x14   : > { %s215_s16 = sshll.u32 %s205_s15, 4  ;;  %p697_p0 = pnand %p704_p13, %p950_p4  ;;  %s216_s16 = int_to_ptr.vmem [resolvable:$true] %s215_s16 }
  0x15   : > { %p684_p1 = scmp.ge.s32.totalorder %s873_s23, 1  ;;  %s202_s24 = scalar_lea.sflag [#allocation4], %s201_s9 }
  0x16   : > { %s875_s25 = smov 256   ;;  %s876_s27 = smov 16  }
  0x17   : > { %699 = dma.hbm_to_vmem [thread:$0]  (!%p697_p0), %s214_s17, 2048, %s216_s16, %s202_s24, %s875_s25, %s875_s25, %s876_s27  }
  0x18   : > { %p223_p2 = scmp.lt.s32.totalorder %s873_s23, 3 }
  0x1a   : > { %p224_p3 = pnand %p684_p1, %p223_p2 }
  0x1b   : > { %s983_s29 = sand.u32 (!%p224_p3), 1, %s857_s19  }
  0x1c   : > { %227 = sbr.rel (%p224_p3) target bundleno = 664 (0x298), region = 40  ;;  %s685_s10 = sshll.u32 (!%p224_p3), %s983_s29, 7 }
  0x1d   : > { %s230_s11 = scalar_lea.sflag (!%p224_p3), [#allocation4], %s983_s29  ;;  %s233_s12 = scalar_lea.vmem (!%p224_p3), [#allocation3], %s685_s10 }
  0x21   : > { %844 = dma.done.wait (%p956_p8), %s230_s11, 2048  }
  0x22   : > { %846 = vsyncadd (%p956_p8), %s230_s11, 4294965248  ;;  %v267_v0 = vld [vmem:[%s233_s12] sm:$0xff]  ;;  %v268_v1 = vld [vmem:[%s233_s12 + $0x8] sm:$0xff]  ;;  %v877_v24 = vmov 0   ;;  %vm265_vm0 = vcmask 516096   ;;  %vm488_vm1 = vcmask 130112   ;;  %s596_s24 = scalar_lea.hbm %s1071_s5, %s865_s21 }
  0x23   : > { %v284_v2 = vadd.f32 %v268_v1, %v267_v0  ;;  %v271_v3 = vld [vmem:[%s233_s12 + $0x20] sm:$0xff]  ;;  %v272_v4 = vld [vmem:[%s233_s12 + $0x28] sm:$0xff]  ;;  %v269_v8 = vld [vmem:[%s233_s12 + $0x10] sm:$0xff]  ;;  %758 = vset.pattern.permute.xlu2 %v877_v24  ;;  %759 = vset.pattern.permute.xlu0 %v877_v24  ;;  %vm492_vm2 = vcmask 195712   ;;  %vm496_vm3 = vcmask 261312   ;;  %vm500_vm4 = vcmask 326912  }
  0x24   : > { %v290_v5 = vadd.f32 %v272_v4, %v271_v3  ;;  %v275_v6 = vld [vmem:[%s233_s12 + $0x40] sm:$0xff]  ;;  %v276_v7 = vld [vmem:[%s233_s12 + $0x48] sm:$0xff]  ;;  %v270_v9 = vld [vmem:[%s233_s12 + $0x18] sm:$0xff]  ;;  %760 = vset.pattern.permute.xlu1 %v877_v24  ;;  %vm504_vm5 = vcmask 392512   ;;  %vm508_vm6 = vcmask 458112   ;;  %vm512_vm7 = vcmask 523712  }
  0x25   : > { %285 = vadd.xlane.f32.xlu0 %v284_v2  ;;  %v296_v10 = vadd.f32 %v276_v7, %v275_v6  ;;  %v273_v11 = vld [vmem:[%s233_s12 + $0x30] sm:$0xff]  ;;  %v274_v12 = vld [vmem:[%s233_s12 + $0x38] sm:$0xff]  ;;  %v287_v13 = vadd.f32 %v270_v9, %v269_v8  ;;  %v279_v18 = vld [vmem:[%s233_s12 + $0x60] sm:$0xff]  ;;  %vm531_vm8 = vcmask 523264   ;;  %vm562_vm9 = vcmask 1043456   ;;  %s259_s10 = scalar_lea.vmem [#allocation6], %s983_s29 }
  0x26   : > { %291 = vadd.xlane.f32.xlu1 %v290_v5  ;;  %v277_v14 = vld [vmem:[%s233_s12 + $0x50] sm:$0xff]  ;;  %v278_v15 = vld [vmem:[%s233_s12 + $0x58] sm:$0xff]  ;;  %v293_v16 = vadd.f32 %v274_v12, %v273_v11  ;;  %v280_v19 = vld [vmem:[%s233_s12 + $0x68] sm:$0xff]  ;;  %vm558_vm10 = vcmask 31744   ;;  %s598_s11 = sshll.u32 %s259_s10, 4  ;;  %s588_s28 = scalar_lea.sflag [#allocation5], %s983_s29  ;;  %s599_s11 = int_to_ptr.vmem [resolvable:$true] %s598_s11 }
  0x27   : > { %297 = vadd.xlane.f32.xlu2 %v296_v10  ;;  %v299_v17 = vadd.f32 %v278_v15, %v277_v14  ;;  %v281_v20 = vld [vmem:[%s233_s12 + $0x70] sm:$0xff]  ;;  %v282_v21 = vld [vmem:[%s233_s12 + $0x78] sm:$0xff]  ;;  %v302_v22 = vadd.f32 %v280_v19, %v279_v18  ;;  %s600_s12 = sshll.u32 %s596_s24, 4  ;;  %s811_s14 = scalar_lea.hbm %s1071_s5, 2  ;;  %s601_s12 = int_to_ptr.hbm [resolvable:$true] %s600_s12 }
  0x28   : > { %v305_v23 = vadd.f32 %v282_v21, %v281_v20  ;;  %s805_s30 = sshra.s32 %s601_s12, 4  ;;  %s806_s30 = int_to_ptr.hbm [resolvable:$true] %s805_s30 }
  0x29   : > { %s807_s9 = scalar_lea.hbm %s806_s30, 1  ;;  %p812_p7 = scmp.lt.s32.totalorder %s806_s30, %s1071_s5 }
  0x2a   : > { %p808_p4 = scmp.ne.s32.totalorder %s806_s30, %s807_s9  ;;  %p813_p8 = scmp.lt.s32.totalorder %s811_s14, %s807_s9 }
  0x2c   : > { %p809_p5 = pnand %p808_p4, %p960_p9  ;;  %p814_p10 = por %p813_p8, %p812_p7 }
  0x2d   : > { %288 = vadd.xlane.f32.xlu0 %v287_v13 }
  0x2e   : > { %294 = vadd.xlane.f32.xlu1 %v293_v16  ;;  %p810_p6 = pneg %p809_p5 }
  0x2f   : > { %300 = vadd.xlane.f32.xlu2 %v299_v17 }
  0x30   : > { %p815_p13 = pnand %p814_p10, %p810_p6 }
  0x35   : > { %303 = vadd.xlane.f32.xlu0 %v302_v22 }
  0x36   : > { %306 = vadd.xlane.f32.xlu1 %v305_v23 }
  0x98   : > { %v286_v25 = vpop.xlane.xlu0 %285 }
  0x99   : > { %v316_v26 = vperm.slane %v286_v25, 0  ;;  %v317_v27 = vperm.slane %v286_v25, 1  ;;  %v318_v28 = vperm.slane %v286_v25, 2  ;;  %v319_v29 = vperm.slane %v286_v25, 3  ;;  %v292_v44 = vpop.xlane.xlu1 %291 }
  0x9a   : > { %v320_v30 = vperm.slane %v286_v25, 4  ;;  %v321_v31 = vperm.slane %v286_v25, 5  ;;  %v322_v32 = vperm.slane %v286_v25, 6  ;;  %v323_v33 = vperm.slane %v286_v25, 7  ;;  %v298_v0 = vpop.xlane.xlu2 %297 }
  0x9b   : > { %380 = vst [vmem:[#allocation1] ss:$9 sm:$0xff] %v316_v26  ;;  %v332_v45 = vperm.slane %v292_v44, 0  ;;  %v333_v46 = vperm.slane %v292_v44, 1  ;;  %v334_v47 = vperm.slane %v292_v44, 2  ;;  %v335_v49 = vperm.slane %v292_v44, 3 }
  0x9c   : > { %382 = vst [vmem:[#allocation1 + $0x1] ss:$9 sm:$0xff] %v317_v27  ;;  %v336_v50 = vperm.slane %v292_v44, 4  ;;  %v337_v51 = vperm.slane %v292_v44, 5  ;;  %v338_v52 = vperm.slane %v292_v44, 6  ;;  %v339_v53 = vperm.slane %v292_v44, 7 }
  0x9d   : > { %384 = vst [vmem:[#allocation1 + $0x2] ss:$9 sm:$0xff] %v318_v28  ;;  %v348_v1 = vperm.slane %v298_v0, 0  ;;  %v349_v2 = vperm.slane %v298_v0, 1  ;;  %v350_v3 = vperm.slane %v298_v0, 2  ;;  %v351_v5 = vperm.slane %v298_v0, 3 }
  0x9e   : > { %386 = vst [vmem:[#allocation1 + $0x3] ss:$9 sm:$0xff] %v319_v29  ;;  %v352_v6 = vperm.slane %v298_v0, 4  ;;  %v353_v7 = vperm.slane %v298_v0, 5  ;;  %v354_v8 = vperm.slane %v298_v0, 6  ;;  %v355_v9 = vperm.slane %v298_v0, 7 }
  0x9f   : > { %388 = vst [vmem:[#allocation1 + $0x4] ss:$9 sm:$0xff] %v320_v30  ;;  %v527_v44 = vld [vmem:[%s1067_s1 + $0x28] sm:$0xff] }
  0xa0   : > { %390 = vst [vmem:[#allocation1 + $0x5] ss:$9 sm:$0xff] %v321_v31  ;;  %v289_v34 = vpop.xlane.xlu0 %288 }
  0xa1   : > { %392 = vst [vmem:[#allocation1 + $0x6] ss:$9 sm:$0xff] %v322_v32  ;;  %v324_v35 = vperm.slane %v289_v34, 0  ;;  %v325_v36 = vperm.slane %v289_v34, 1  ;;  %v326_v37 = vperm.slane %v289_v34, 2  ;;  %v327_v39 = vperm.slane %v289_v34, 3  ;;  %v295_v54 = vpop.xlane.xlu1 %294 }
  0xa2   : > { %394 = vst [vmem:[#allocation1 + $0x7] ss:$9 sm:$0xff] %v323_v33  ;;  %v328_v40 = vperm.slane %v289_v34, 4  ;;  %v329_v41 = vperm.slane %v289_v34, 5  ;;  %v330_v42 = vperm.slane %v289_v34, 6  ;;  %v331_v43 = vperm.slane %v289_v34, 7  ;;  %v301_v10 = vpop.xlane.xlu2 %300 }
  0xa3   : > { %v340_v55 = vperm.slane %v295_v54, 0  ;;  %v341_v56 = vperm.slane %v295_v54, 1  ;;  %v342_v57 = vperm.slane %v295_v54, 2  ;;  %v343_v59 = vperm.slane %v295_v54, 3 }
  0xa4   : > { %v344_v60 = vperm.slane %v295_v54, 4  ;;  %v345_v61 = vperm.slane %v295_v54, 5  ;;  %v346_v62 = vperm.slane %v295_v54, 6  ;;  %v347_v63 = vperm.slane %v295_v54, 7 }
  0xa5   : > { %v356_v11 = vperm.slane %v301_v10, 0  ;;  %v357_v12 = vperm.slane %v301_v10, 1  ;;  %v358_v13 = vperm.slane %v301_v10, 2  ;;  %v359_v15 = vperm.slane %v301_v10, 3 }
  0xa6   : > { %v360_v16 = vperm.slane %v301_v10, 4  ;;  %v361_v17 = vperm.slane %v301_v10, 5  ;;  %v362_v18 = vperm.slane %v301_v10, 6  ;;  %v363_v19 = vperm.slane %v301_v10, 7 }
  0xa8   : > { %v304_v20 = vpop.xlane.xlu0 %303 }
  0xa9   : > { %v395_v38 = vld [vmem:[#allocation1] sm:$0xff]  ;;  %v364_v21 = vperm.slane %v304_v20, 0  ;;  %v365_v22 = vperm.slane %v304_v20, 1  ;;  %v366_v23 = vperm.slane %v304_v20, 2  ;;  %v367_v24 = vperm.slane %v304_v20, 3  ;;  %v307_v30 = vpop.xlane.xlu1 %306 }
  0xaa   : > { %396 = vst [vmem:[#allocation1] ss:$9 sm:$0xff] %v324_v35  ;;  %460 = vperm.xlu2 %758, %v395_v38   ;;  %v368_v26 = vperm.slane %v304_v20, 4  ;;  %v369_v27 = vperm.slane %v304_v20, 5  ;;  %v370_v28 = vperm.slane %v304_v20, 6  ;;  %v371_v29 = vperm.slane %v304_v20, 7 }
  0xab   : > { %397 = vst [vmem:[#allocation1 + $0x1] ss:$9 sm:$0xff] %v325_v36  ;;  %v372_v31 = vperm.slane %v307_v30, 0  ;;  %v373_v32 = vperm.slane %v307_v30, 1  ;;  %v374_v33 = vperm.slane %v307_v30, 2  ;;  %v375_v34 = vperm.slane %v307_v30, 3 }
  0xac   : > { %398 = vst [vmem:[#allocation1 + $0x2] ss:$9 sm:$0xff] %v326_v37  ;;  %v376_v36 = vperm.slane %v307_v30, 4  ;;  %v377_v37 = vperm.slane %v307_v30, 5  ;;  %v378_v38 = vperm.slane %v307_v30, 6 }
  0xad   : > { %399 = vst [vmem:[#allocation1 + $0x3] ss:$9 sm:$0xff] %v327_v39  ;;  %v379_v39 = vperm.slane %v307_v30, 7 }
  0xae   : > { %400 = vst [vmem:[#allocation1 + $0x4] ss:$9 sm:$0xff] %v328_v40 }
  0xaf   : > { %401 = vst [vmem:[#allocation1 + $0x5] ss:$9 sm:$0xff] %v329_v41  ;;  %v529_v41 = vld [vmem:[%s1067_s1 + $0x38] sm:$0xff] }
  0xb0   : > { %402 = vst [vmem:[#allocation1 + $0x6] ss:$9 sm:$0xff] %v330_v42  ;;  %543 = vmatpush.msra.mxu0 %v529_v41  ;;  %v878_v42 = vmov 0.0  }
  0xb1   : > { %403 = vst [vmem:[#allocation1 + $0x7] ss:$9 sm:$0xff] %v331_v43  ;;  %v528_v43 = vld [vmem:[%s1067_s1 + $0x30] sm:$0xff] }
  0xb2   : > { %266 = vst.msk [vmem:[#allocation2] sm:$0x1] %vm265_vm0, %v878_v42  ;;  %544 = vmatpush.msra.mxu0 %v528_v43 }
  0xb4   : > { %545 = vmatpush.msra.mxu0 %v527_v44 }
  0xb8   : > { %v404_v48 = vld [vmem:[#allocation1] sm:$0xff] }
  0xb9   : > { %405 = vst [vmem:[#allocation1] ss:$9 sm:$0xff] %v332_v45  ;;  %463 = vperm.xlu0 %759, %v404_v48   ;;  %v524_v48 = vld [vmem:[%s1067_s1 + $0x10] sm:$0xff] }
  0xba   : > { %406 = vst [vmem:[#allocation1 + $0x1] ss:$9 sm:$0xff] %v333_v46  ;;  %v526_v46 = vld [vmem:[%s1067_s1 + $0x20] sm:$0xff] }
  0xbb   : > { %407 = vst [vmem:[#allocation1 + $0x2] ss:$9 sm:$0xff] %v334_v47  ;;  %546 = vmatpush.msra.mxu0 %v526_v46  ;;  %v525_v47 = vld [vmem:[%s1067_s1 + $0x18] sm:$0xff] }
  0xbc   : > { %408 = vst [vmem:[#allocation1 + $0x3] ss:$9 sm:$0xff] %v335_v49  ;;  %v523_v49 = vld [vmem:[%s1067_s1 + $0x8] sm:$0xff] }
  0xbd   : > { %409 = vst [vmem:[#allocation1 + $0x4] ss:$9 sm:$0xff] %v336_v50  ;;  %547 = vmatpush.msra.mxu0 %v525_v47  ;;  %v483_v50 = vlaneseq }
  0xbe   : > { %410 = vst [vmem:[#allocation1 + $0x5] ss:$9 sm:$0xff] %v337_v51  ;;  %v522_v51 = vld [vmem:[%s1067_s1] sm:$0xff] }
  0xbf   : > { %411 = vst [vmem:[#allocation1 + $0x6] ss:$9 sm:$0xff] %v338_v52  ;;  %548 = vmatpush.msra.mxu0 %v524_v48 }
  0xc0   : > { %412 = vst [vmem:[#allocation1 + $0x7] ss:$9 sm:$0xff] %v339_v53  ;;  %v484_v53 = vand.u32 127, %v483_v50 }
  0xc1   : > { %549 = vmatpush.msra.mxu0 %v523_v49 }
  0xc2   : > { %v486_v54 = vadd.s32 4294967288, %v484_v53  ;;  %v502_v0 = vadd.s32 4294967256, %v484_v53  ;;  %v510_v10 = vadd.s32 4294967240, %v484_v53 }
  0xc3   : > { %550 = vmatpush.msra.mxu0 %v522_v51 }
  0xc7   : > { %v413_v58 = vld [vmem:[#allocation1] sm:$0xff] }
  0xc8   : > { %414 = vst [vmem:[#allocation1] ss:$9 sm:$0xff] %v340_v55  ;;  %466 = vperm.xlu1 %760, %v413_v58  }
  0xc9   : > { %415 = vst [vmem:[#allocation1 + $0x1] ss:$9 sm:$0xff] %v341_v56  ;;  %v490_v56 = vadd.s32 4294967280, %v484_v53 }
  0xca   : > { %416 = vst [vmem:[#allocation1 + $0x2] ss:$9 sm:$0xff] %v342_v57 }
  0xcb   : > { %417 = vst [vmem:[#allocation1 + $0x3] ss:$9 sm:$0xff] %v343_v59 }
  0xcc   : > { %418 = vst [vmem:[#allocation1 + $0x4] ss:$9 sm:$0xff] %v344_v60 }
  0xcd   : > { %419 = vst [vmem:[#allocation1 + $0x5] ss:$9 sm:$0xff] %v345_v61  ;;  %v494_v61 = vadd.s32 4294967272, %v484_v53 }
  0xce   : > { %420 = vst [vmem:[#allocation1 + $0x6] ss:$9 sm:$0xff] %v346_v62 }
  0xcf   : > { %421 = vst [vmem:[#allocation1 + $0x7] ss:$9 sm:$0xff] %v347_v63 }
  0xd6   : > { %v422_v4 = vld [vmem:[#allocation1] sm:$0xff] }
  0xd7   : > { %423 = vst [vmem:[#allocation1] ss:$9 sm:$0xff] %v348_v1  ;;  %469 = vperm.xlu2 %758, %v422_v4   ;;  %v498_v1 = vadd.s32 4294967264, %v484_v53 }
  0xd8   : > { %424 = vst [vmem:[#allocation1 + $0x1] ss:$9 sm:$0xff] %v349_v2 }
  0xd9   : > { %425 = vst [vmem:[#allocation1 + $0x2] ss:$9 sm:$0xff] %v350_v3 }
  0xda   : > { %426 = vst [vmem:[#allocation1 + $0x3] ss:$9 sm:$0xff] %v351_v5 }
  0xdb   : > { %427 = vst [vmem:[#allocation1 + $0x4] ss:$9 sm:$0xff] %v352_v6 }
  0xdc   : > { %428 = vst [vmem:[#allocation1 + $0x5] ss:$9 sm:$0xff] %v353_v7 }
  0xdd   : > { %429 = vst [vmem:[#allocation1 + $0x6] ss:$9 sm:$0xff] %v354_v8  ;;  %v506_v8 = vadd.s32 4294967248, %v484_v53 }
  0xde   : > { %430 = vst [vmem:[#allocation1 + $0x7] ss:$9 sm:$0xff] %v355_v9 }
  0xe5   : > { %v431_v14 = vld [vmem:[#allocation1] sm:$0xff] }
  0xe6   : > { %432 = vst [vmem:[#allocation1] ss:$9 sm:$0xff] %v356_v11  ;;  %472 = vperm.xlu2 %758, %v431_v14  }
  0xe7   : > { %433 = vst [vmem:[#allocation1 + $0x1] ss:$9 sm:$0xff] %v357_v12 }
  0xe8   : > { %434 = vst [vmem:[#allocation1 + $0x2] ss:$9 sm:$0xff] %v358_v13 }
  0xe9   : > { %435 = vst [vmem:[#allocation1 + $0x3] ss:$9 sm:$0xff] %v359_v15  ;;  %v283_v15 = vld [vmem:[#allocation2] sm:$0x1] }
  0xea   : > { %436 = vst [vmem:[#allocation1 + $0x4] ss:$9 sm:$0xff] %v360_v16 }
  0xeb   : > { %437 = vst [vmem:[#allocation1 + $0x5] ss:$9 sm:$0xff] %v361_v17 }
  0xec   : > { %438 = vst [vmem:[#allocation1 + $0x6] ss:$9 sm:$0xff] %v362_v18 }
  0xed   : > { %439 = vst [vmem:[#allocation1 + $0x7] ss:$9 sm:$0xff] %v363_v19 }
  0xf4   : > { %v440_v25 = vld [vmem:[#allocation1] sm:$0xff] }
  0xf5   : > { %475 = vperm.xlu1 %760, %v440_v25   ;;  %441 = vst [vmem:[#allocation1] ss:$9 sm:$0xff] %v364_v21  ;;  %v556_v21 = vld [vmem:[%s1069_s3] sm:$0xf] }
  0xf6   : > { %442 = vst [vmem:[#allocation1 + $0x1] ss:$9 sm:$0xff] %v365_v22  ;;  %687 = vmatpush.msk.msra.mxu1 %vm562_vm9, %v556_v21  ;;  %v530_v22 = vld [vmem:[%s1068_s2] sm:$0x1] }
  0xf7   : > { %443 = vst [vmem:[#allocation1 + $0x2] ss:$9 sm:$0xff] %v366_v23 }
  0xf8   : > { %444 = vst [vmem:[#allocation1 + $0x3] ss:$9 sm:$0xff] %v367_v24 }
  0xf9   : > { %445 = vst [vmem:[#allocation1 + $0x4] ss:$9 sm:$0xff] %v368_v26  ;;  %v557_v26 = vld [vmem:[%s1070_s4] sm:$0x1] }
  0xfa   : > { %446 = vst [vmem:[#allocation1 + $0x5] ss:$9 sm:$0xff] %v369_v27 }
  0xfb   : > { %447 = vst [vmem:[#allocation1 + $0x6] ss:$9 sm:$0xff] %v370_v28 }
  0xfc   : > { %448 = vst [vmem:[#allocation1 + $0x7] ss:$9 sm:$0xff] %v371_v29 }
 0x103   : > { %v449_v35 = vld [vmem:[#allocation1] sm:$0xff] }
 0x104   : > { %478 = vperm.xlu2 %758, %v449_v35   ;;  %450 = vst [vmem:[#allocation1] ss:$9 sm:$0xff] %v372_v31  ;;  %v461_v45 = vpop.permute.xlu2 %460 }
 0x105   : > { %451 = vst [vmem:[#allocation1 + $0x1] ss:$9 sm:$0xff] %v373_v32  ;;  %v485_v60 = vperm.slane %v461_v45, %v484_v53 }
 0x106   : > { %452 = vst [vmem:[#allocation1 + $0x2] ss:$9 sm:$0xff] %v374_v33 }
 0x107   : > { %453 = vst [vmem:[#allocation1 + $0x3] ss:$9 sm:$0xff] %v375_v34 }
 0x108   : > { %454 = vst [vmem:[#allocation1 + $0x4] ss:$9 sm:$0xff] %v376_v36 }
 0x109   : > { %455 = vst [vmem:[#allocation1 + $0x5] ss:$9 sm:$0xff] %v377_v37 }
 0x10a   : > { %456 = vst [vmem:[#allocation1 + $0x6] ss:$9 sm:$0xff] %v378_v38 }
 0x10b   : > { %457 = vst [vmem:[#allocation1 + $0x7] ss:$9 sm:$0xff] %v379_v39 }
 0x112   : > { %v458_v40 = vld [vmem:[#allocation1] sm:$0xff] }
 0x113   : > { %481 = vperm.xlu1 %760, %v458_v40  }
 0x12b   : > { %v464_v55 = vpop.permute.xlu0 %463 }
 0x12c   : > { %v487_v58 = vperm.slane %v464_v55, %v486_v54 }
 0x12e   : > { %v489_v63 = vsel %vm488_vm1, %v487_v58, %v485_v60 }
 0x131   : > { %v470_v52 = vpop.permute.xlu2 %469 }
 0x132   : > { %v495_v4 = vperm.slane %v470_v52, %v494_v61 }
 0x13a   : > { %v467_v57 = vpop.permute.xlu1 %466 }
 0x13b   : > { %v491_v59 = vperm.slane %v467_v57, %v490_v56 }
 0x13d   : > { %v493_v2 = vsel %vm492_vm2, %v491_v59, %v489_v63 }
 0x13e   : > { %v497_v5 = vsel %vm496_vm3, %v495_v4, %v493_v2 }
 0x140   : > { %v473_v62 = vpop.permute.xlu2 %472 }
 0x141   : > { %v499_v7 = vperm.slane %v473_v62, %v498_v1 }
 0x143   : > { %v501_v11 = vsel %vm500_vm4, %v499_v7, %v497_v5 }
 0x15e   : > { %v479_v9 = vpop.permute.xlu2 %478 }
 0x15f   : > { %v507_v13 = vperm.slane %v479_v9, %v506_v8 }
 0x167   : > { %v476_v3 = vpop.permute.xlu1 %475 }
 0x168   : > { %v503_v6 = vperm.slane %v476_v3, %v502_v0 }
 0x16a   : > { %v505_v12 = vsel %vm504_vm5, %v503_v6, %v501_v11 }
 0x16b   : > { %v509_v17 = vsel %vm508_vm6, %v507_v13, %v505_v12 }
 0x185   : > { %v482_v14 = vpop.permute.xlu1 %481 }
 0x186   : > { %v511_v16 = vperm.slane %v482_v14, %v510_v10 }
 0x188   : > { %v513_v18 = vsel %vm512_vm7, %v511_v16, %v509_v17 }
 0x189   : > { %v515_v19 = vadd.f32 %v513_v18, %v283_v15 }
 0x18b   : > { %517 = vst.msk [vmem:[#allocation2] sm:$0x1] %vm265_vm0, %v515_v19 }
 0x192   : > { %v521_v20 = vld [vmem:[#allocation2] sm:$0x1] }
 0x193   : > { %686 = vmatmul.msk.f32.vlgmr.msra.gmra.mxu0 %vm531_vm8, %v521_v20 }
 0x210   : > { %v552_v23 = vpop.f32.mrf.mxu0 }
 0x211   : > { %v553_v24 = vadd.f32 %v552_v23, %v530_v22 }
 0x213   : > { %v555_v25 = vmax.f32 %v553_v24, 0.0 }
 0x215   : > { %688 = vmatmul.msk.f32.vlgmr.msra.gmra.mxu1 %vm558_vm10, %v555_v25 }
 0x292   : > { %v583_v27 = vpop.f32.mrf.mxu1 }
 0x293   : > { %v584_v28 = vadd.f32 %v583_v27, %v557_v26 }
 0x295   : > { %586 = vst.msk [vmem:[%s259_s10] sm:$0x1] %vm265_vm0, %v584_v28 }
 0x296   : > { %818 = shalt.err (!%p815_p13)
}
 0x297   : > { %694 = dma.vmem_to_hbm [thread:$0]  (%p960_p9), %s599_s11, 16, %s601_s12, %s588_s28  }
 0x298 PF: > { %s612_s29 = sand.u32 1, %s853_s18   ;;  %p701_p0 = pnand %p680_p12, %p967_p11 }
 0x299   : > { %s613_s17 = scalar_lea.sflag [#allocation5], %s612_s29 }
 0x29a   : > { %p702_p1 = pneg %p701_p0 }
 0x29c   : > { %848 = dma.done.wait (%p702_p1), %s613_s17, 16  }
 0x29d   : > { %850 = vsyncadd (%p702_p1), %s613_s17, 4294967280  ;;  %s21_s23 = sadd.s32 1, %s873_s23   ;;  %s1076_s18 = smov %s857_s19 }
 0x29e   : > { %p18_p2 = scmp.ge.s32.totalorder %s21_s23, 4   ;;  %s1077_s19 = smov %s861_s20 }
 0x29f   : > { %s1078_s20 = smov %s965_s7  ;;  %s1079_s21 = smov %s869_s22 }
 0x2a0   : > { %s1080_s22 = smov %s1082_s26  ;;  %20 = sbr.rel (!%p18_p2) target bundleno = 6 (0x6), region = 100 }
 0x2a5   :  { %618 = vsyncpa [#allocation4], 1 }
 0x2a6   :  { %620 = vsyncpa [#allocation4 + $0x1], 1 }
 0x2a7   :  { %621 = vsyncpa [#allocation5], 1 }
 0x2a8   :  { %623 = vsyncpa [#allocation5 + $0x1], 1 }

</bundles_post_ra>
